<compile_context>
chip_gen: v7x
topology: tpu7x:2x2x1
jax: 0.10.0
libtpu: 0.0.40
codegen_flags: <defaults>
</compile_context>

<pallas_src>
import functools

import jax
import jax.numpy as jnp
from jax.experimental import pallas as pl
from jax.experimental.pallas import tpu as pltpu

LANES = 128
TILE_ROWS = 8          # minimum sublane granularity
MAX_BLOCK_ROWS = 1024  # 3 inputs x 2 bufs x 1024x128xf32 = 3 MiB -> fits v5e/v6e/v7x


def _bce_weighted(pred_ref, y_ref, edm_ref):
    """Numerically-stable BCE-with-logits * weight, computed in f32 on-chip."""
    x = pred_ref[...].astype(jnp.float32)
    t = y_ref[...].astype(jnp.float32)
    w = edm_ref[...].astype(jnp.float32)
    # loss = max(x, 0) - x*t + log(1 + exp(-|x|))   (matches PyTorch's kernel)
    loss = jnp.maximum(x, 0.0) - x * t + jnp.log1p(jnp.exp(-jnp.abs(x)))
    return loss * w


def _bce_partial_sum_kernel(pred_ref, y_ref, edm_ref, out_ref):
    """Per-block, per-lane partial sums (sublane-axis reduction only)."""
    weighted = _bce_weighted(pred_ref, y_ref, edm_ref)
    out_ref[...] = jnp.sum(weighted, axis=0, keepdims=True)


def _bce_elementwise_kernel(pred_ref, y_ref, edm_ref, out_ref):
    """Elementwise weighted BCE-with-logits (for reduction='none')."""
    out_ref[...] = _bce_weighted(pred_ref, y_ref, edm_ref).astype(out_ref.dtype)


def _blocking(n):
    """Pick (rows, block_rows, num_blocks) for a lane-dense (rows, 128) slab."""
    rows_needed = pl.cdiv(n, LANES)
    block_rows = min(MAX_BLOCK_ROWS, pl.cdiv(rows_needed, TILE_ROWS) * TILE_ROWS)
    rows = pl.cdiv(rows_needed, block_rows) * block_rows
    return rows, block_rows, rows // block_rows


def _flatten_pad(a, rows):
    """Flatten to 1D (native dtype), zero-pad to rows*LANES, reshape (rows, LANES)."""
    flat = a.reshape(-1)
    pad = rows * LANES - flat.shape[0]
    if pad:
        flat = jnp.pad(flat, (0, pad))
    return flat.reshape(rows, LANES)


@functools.partial(jax.jit, static_argnames=("reduction",))
def bce_loss_with_weights(pred, y, edm, reduction="mean"):
    assert pred.shape == y.shape == edm.shape
    n = pred.size
    rows, block_rows, num_blocks = _blocking(n)

    pred2 = _flatten_pad(pred, rows)
    y2 = _flatten_pad(y, rows)
    edm2 = _flatten_pad(edm, rows)  # zero padding => padded contributions are 0

    in_spec = pl.BlockSpec((block_rows, LANES), lambda i: (i, 0))
    itemsize = pred.dtype.itemsize + y.dtype.itemsize + edm.dtype.itemsize

    if reduction in ("mean", "sum"):
        partials = pl.pallas_call(
            _bce_partial_sum_kernel,
            out_shape=jax.ShapeDtypeStruct((num_blocks, LANES), jnp.float32),
            grid_spec=pltpu.PrefetchScalarGridSpec(
                num_scalar_prefetch=0,
                grid=(num_blocks,),
                in_specs=[in_spec, in_spec, in_spec],
                out_specs=pl.BlockSpec((1, LANES), lambda i: (i, 0)),
            ),
            compiler_params=pltpu.CompilerParams(
                dimension_semantics=("parallel",),
            ),
            cost_estimate=pl.CostEstimate(
                flops=5 * n,
                transcendentals=2 * n,
                bytes_accessed=itemsize * n + 4 * num_blocks * LANES,
            ),
        )(pred2, y2, edm2)
        total = jnp.sum(partials)  # tiny (num_blocks, 128) finish
        if reduction == "mean":
            return total / jnp.float32(n)
        return total
    else:  # 'none' -> elementwise weighted loss in the original shape
        out_dtype = jnp.result_type(pred.dtype, edm.dtype)
        out2 = pl.pallas_call(
            _bce_elementwise_kernel,
            out_shape=jax.ShapeDtypeStruct((rows, LANES), out_dtype),
            grid_spec=pltpu.PrefetchScalarGridSpec(
                num_scalar_prefetch=0,
                grid=(num_blocks,),
                in_specs=[in_spec, in_spec, in_spec],
                out_specs=pl.BlockSpec((block_rows, LANES), lambda i: (i, 0)),
            ),
            compiler_params=pltpu.CompilerParams(
                dimension_semantics=("parallel",),
            ),
            cost_estimate=pl.CostEstimate(
                flops=5 * n,
                transcendentals=2 * n,
                bytes_accessed=(itemsize + out_dtype.itemsize) * n,
            ),
        )(pred2, y2, edm2)
        return out2.reshape(-1)[:n].reshape(pred.shape)


def _reference(pred, y, edm, reduction="mean"):
    x = pred.astype(jnp.float32)
    t = y.astype(jnp.float32)
    loss = jnp.maximum(x, 0.0) - x * t + jnp.log1p(jnp.exp(-jnp.abs(x)))
    wl = loss * edm.astype(jnp.float32)
    if reduction == "mean":
        return jnp.mean(wl)
    if reduction == "sum":
        return jnp.sum(wl)
    return wl


if __name__ == "__main__":
    key = jax.random.PRNGKey(0)
    k1, k2, k3 = jax.random.split(key, 3)

    # NCHW inputs, small shapes (like the PyTorch module usage)
    shape = (2, 4, 16, 16)
    pred = jax.random.normal(k1, shape, dtype=jnp.float32)           # logits
    y = (jax.random.uniform(k2, shape) > 0.5).astype(jnp.float32)    # targets in {0,1}
    edm = jax.random.uniform(k3, shape, dtype=jnp.float32) + 0.1     # positive weights

    out = jax.block_until_ready(bce_loss_with_weights(pred, y, edm, reduction="mean"))
    ref = _reference(pred, y, edm, reduction="mean")
    assert jnp.allclose(out, ref, rtol=1e-5, atol=1e-5), (out, ref)

    out_sum = jax.block_until_ready(bce_loss_with_weights(pred, y, edm, reduction="sum"))
    assert jnp.allclose(out_sum, _reference(pred, y, edm, "sum"), rtol=1e-5, atol=1e-4)

    out_none = jax.block_until_ready(bce_loss_with_weights(pred, y, edm, reduction="none"))
    assert jnp.allclose(out_none, _reference(pred, y, edm, "none"), rtol=1e-5, atol=1e-5)

    print("KERNEL_OK")
</pallas_src>

<mosaic_0001>
module attributes {stable_mosaic.version = 11 : i64} {
  func.func @_bce_partial_sum_kernel(%arg0: i32, %arg1: memref<16x128xf32, #tpu.memory_space<vmem>>, %arg2: memref<16x128xf32, #tpu.memory_space<vmem>>, %arg3: memref<16x128xf32, #tpu.memory_space<vmem>>, %arg4: memref<1x128xf32, #tpu.memory_space<vmem>>) attributes {dimension_semantics = [#tpu.dimension_semantics<parallel>], iteration_bounds = array<i64: 1>, scalar_prefetch = 0 : i64, scratch_operands = 0 : i64, tpu.core_type = #tpu.core_type<tc>, window_params = [{transform_indices = @transform_0, window_bounds = array<i64: 16, 128>}, {transform_indices = @transform_1, window_bounds = array<i64: 16, 128>}, {transform_indices = @transform_2, window_bounds = array<i64: 16, 128>}, {transform_indices = @transform_3, window_bounds = array<i64: 1, 128>}]} {
    %c0 = arith.constant 0 : index
    %c0_0 = arith.constant 0 : index
    %0 = vector.load %arg1[%c0, %c0_0] : memref<16x128xf32, #tpu.memory_space<vmem>>, vector<16x128xf32>
    %c0_1 = arith.constant 0 : index
    %c0_2 = arith.constant 0 : index
    %1 = vector.load %arg2[%c0_1, %c0_2] : memref<16x128xf32, #tpu.memory_space<vmem>>, vector<16x128xf32>
    %c0_3 = arith.constant 0 : index
    %c0_4 = arith.constant 0 : index
    %2 = vector.load %arg3[%c0_3, %c0_4] : memref<16x128xf32, #tpu.memory_space<vmem>>, vector<16x128xf32>
    %cst = arith.constant 0.000000e+00 : f32
    %3 = vector.broadcast %cst : f32 to vector<16x128xf32>
    %4 = arith.maximumf %0, %3 : vector<16x128xf32>
    %5 = arith.mulf %0, %1 : vector<16x128xf32>
    %6 = arith.subf %4, %5 : vector<16x128xf32>
    %7 = math.absf %0 : vector<16x128xf32>
    %cst_5 = arith.constant 0.000000e+00 : f32
    %8 = vector.broadcast %cst_5 : f32 to vector<16x128xf32>
    %9 = arith.subf %8, %7 : vector<16x128xf32>
    %10 = math.exp %9 : vector<16x128xf32>
    %11 = math.log1p %10 : vector<16x128xf32>
    %12 = arith.addf %6, %11 : vector<16x128xf32>
    %13 = arith.mulf %12, %2 : vector<16x128xf32>
    %cst_6 = arith.constant dense<0.000000e+00> : vector<128xf32>
    %14 = vector.multi_reduction <add>, %13, %cst_6 [0] : vector<16x128xf32> to vector<128xf32>
    %15 = vector.shape_cast %14 : vector<128xf32> to vector<1x128xf32>
    %c0_7 = arith.constant 0 : index
    %c0_8 = arith.constant 0 : index
    %16 = vector.load %arg4[%c0_7, %c0_8] : memref<1x128xf32, #tpu.memory_space<vmem>>, vector<1x128xf32>
    tpu.vector_store %arg4[%c0_7, %c0_8], %15 {strides = array<i32>} : memref<1x128xf32, #tpu.memory_space<vmem>>, vector<1x128xf32>,
    return
  }
  func.func @transform_0(%arg0: i32) -> (i32, i32) {
    %c0_i32 = arith.constant 0 : i32
    %c0_i32_0 = arith.constant 0 : i32
    return %arg0, %c0_i32 : i32, i32
  }
  func.func @transform_1(%arg0: i32) -> (i32, i32) {
    %c0_i32 = arith.constant 0 : i32
    %c0_i32_0 = arith.constant 0 : i32
    return %arg0, %c0_i32 : i32, i32
  }
  func.func @transform_2(%arg0: i32) -> (i32, i32) {
    %c0_i32 = arith.constant 0 : i32
    %c0_i32_0 = arith.constant 0 : i32
    return %arg0, %c0_i32 : i32, i32
  }
  func.func @transform_3(%arg0: i32) -> (i32, i32) {
    %c0_i32 = arith.constant 0 : i32
    %c0_i32_0 = arith.constant 0 : i32
    return %arg0, %c0_i32 : i32, i32
  }
}

</mosaic_0001>

<bundles_post_ra>
// kernel: bce_loss_with_weights.1
= control target key start
LH: loop header
LB: loop body
LE: loop exit
PB: predicated region body
PF: predicated region fallthrough
CT: control target
= control target key end

     0   :  { %s117_s0 = inlined_call_operand.vmem [shape: f32[16,128], index: 0, kind: input, shape index: {}]   ;;  %s118_s1 = inlined_call_operand.vmem [shape: f32[16,128], index: 1, kind: input, shape index: {}]   ;;  %s119_s2 = inlined_call_operand.vmem [shape: f32[16,128], index: 2, kind: input, shape index: {}]   ;;  %s120_s3 = inlined_call_operand.vmem [shape: f32[1,128], index: 3, kind: output, shape index: {}]  }
   0x1   :  { %v14_v0 = vld [vmem:[%s117_s0] sm:$0xff]  ;;  %v15_v1 = vld [vmem:[%s117_s0 + $0x8] sm:$0xff] }
   0x2   :  { %v26_v2 = vand.u32 2147483647, %v14_v0  ;;  %v27_v3 = vand.u32 2147483647, %v15_v1  ;;  %v16_v14 = vld [vmem:[%s118_s1] sm:$0xff]  ;;  %v17_v15 = vld [vmem:[%s118_s1 + $0x8] sm:$0xff] }
   0x3   :  { %v20_v17 = vmax.f32 %v14_v0, 0.0  ;;  %v22_v18 = vmul.f32 %v16_v14, %v14_v0  ;;  %v21_v21 = vmax.f32 %v15_v1, 0.0  ;;  %v23_v22 = vmul.f32 %v17_v15, %v15_v1  ;;  %v18_v32 = vld [vmem:[%s119_s2] sm:$0xff]  ;;  %v19_v34 = vld [vmem:[%s119_s2 + $0x8] sm:$0xff] }
   0x4   :  { %v28_v4 = vsub.f32 0.0, %v26_v2  ;;  %v29_v5 = vsub.f32 0.0, %v27_v3 }
   0x5   :  { %v24_v26 = vsub.f32 %v20_v17, %v22_v18  ;;  %v25_v29 = vsub.f32 %v21_v21, %v23_v22 }
   0x6   :  { %v30_v6 = vmul.f32 1.442695, %v28_v4  ;;  %v32_v7 = vmul.f32 1.442695, %v29_v5 }
   0x8   :  { %68 = vpow2.f32 %v30_v6 }
   0x9   :  { %70 = vpow2.f32 %v32_v7 }
  0x12   :  { %v69_v8 = vpop.eup %68 }
  0x13   :  { %v71_v9 = vpop.eup %70  ;;  %v34_v10 = vadd.f32 1.0, %v69_v8  ;;  %v37_v12 = vmul.f32 -0.5, %v69_v8  ;;  %v40_v19 = vand.u32 2147483647, %v69_v8 }
  0x14   :  { %v43_v11 = vadd.f32 1.0, %v71_v9  ;;  %v46_v13 = vmul.f32 -0.5, %v71_v9  ;;  %v49_v23 = vand.u32 2147483647, %v71_v9 }
  0x15   :  { %72 = vlog2.f32 %v34_v10  ;;  %v38_v16 = vadd.f32 1.0, %v37_v12  ;;  %vm41_vm0 = vcmp.lt.f32.partialorder %v40_v19, 0.0004427343 }
  0x16   :  { %74 = vlog2.f32 %v43_v11  ;;  %v47_v20 = vadd.f32 1.0, %v46_v13  ;;  %vm50_vm1 = vcmp.lt.f32.partialorder %v49_v23, 0.0004427343 }
  0x17   :  { %v39_v24 = vmul.f32 %v69_v8, %v38_v16 }
  0x18   :  { %v48_v27 = vmul.f32 %v71_v9, %v47_v20 }
  0x1f   :  { %v73_v25 = vpop.eup %72 }
  0x20   :  { %v75_v28 = vpop.eup %74  ;;  %v36_v30 = vmul.f32 0.6931472, %v73_v25 }
  0x21   :  { %v45_v31 = vmul.f32 0.6931472, %v75_v28 }
  0x22   :  { %v42_v33 = vsel %vm41_vm0, %v39_v24, %v36_v30 }
  0x23   :  { %v51_v35 = vsel %vm50_vm1, %v48_v27, %v45_v31  ;;  %v52_v36 = vadd.f32 %v42_v33, %v24_v26 }
  0x24   :  { %v53_v37 = vadd.f32 %v51_v35, %v25_v29 }
  0x25   :  { %v54_v38 = vmul.f32 %v52_v36, %v18_v32 }
  0x26   :  { %v55_v39 = vmul.f32 %v53_v37, %v19_v34 }
  0x28   :  { %v56_v40 = vadd.f32 %v55_v39, %v54_v38 }
  0x2a   :  { %v57_v41 = vrot.slane %v56_v40, 4 }
  0x2c   :  { %v58_v42 = vadd.f32 %v57_v41, %v56_v40 }
  0x2e   :  { %v59_v43 = vrot.slane %v58_v42, 2 }
  0x30   :  { %v60_v44 = vadd.f32 %v59_v43, %v58_v42 }
  0x32   :  { %v61_v45 = vrot.slane %v60_v44, 1 }
  0x34   :  { %v62_v46 = vadd.f32 %v61_v45, %v60_v44 }
  0x36   :  { %63 = vst [vmem:[%s120_s3] sm:$0x1] %v62_v46 }

</bundles_post_ra>
